<compile_context>
chip_gen: v7x
topology: tpu7x:2x2x1
jax: 0.10.0
libtpu: 0.0.40
codegen_flags: <defaults>
</compile_context>

<pallas_src>
import functools

import jax
import jax.numpy as jnp
from jax import lax
from jax.experimental import pallas as pl
from jax.experimental.pallas import tpu as pltpu

MARGIN = 2.0
_EPS = 1e-6        # F.pairwise_distance default eps
_NUM_CORES = 2     # TensorCores per chip on v7x; harmless (serialized) on v5e/v6e.


def _cdiv(a, b):
    return -(-a // b)


def _vmem_plan():
    """(tile budget bytes, vmem_limit_bytes) derived from the chip's VMEM."""
    try:
        cap = int(pltpu.get_tpu_info().vmem_capacity_bytes)
    except Exception:
        cap = 64 * 1024 * 1024          # conservative fallback: v7x-sized VMEM
    if cap >= 96 * 1024 * 1024:         # v5e / v6e: 128 MiB VMEM per core
        return 48 * 1024 * 1024, 64 * 1024 * 1024
    # v7x: 64 MiB physical / 32 MiB scoped per TensorCore
    return 18 * 1024 * 1024, 32 * 1024 * 1024


def _contrastive_loss_kernel(o1_ref, o2_ref, lbl_ref, out_ref, *,
                             total_b, block_rows, margin, needs_mask):
    c = pl.program_id(0)   # core (parallel axis)
    i = pl.program_id(1)   # batch tile within this core (reduction axis)

    @pl.when(i == 0)
    def _():
        out_ref[...] = jnp.zeros_like(out_ref)

    # Upcast inside the kernel so bf16 inputs stream at half the HBM bytes.
    o1 = o1_ref[...].astype(jnp.float32)            # (tb, D)
    o2 = o2_ref[...].astype(jnp.float32)            # (tb, D)
    lbl = lbl_ref[...].astype(jnp.float32)          # (1, tb)  lane-dense

    d = o1 - o2 + _EPS                              # matches torch: (x1 - x2 + eps)
    sq = jnp.sum(d * d, axis=-1, keepdims=True)     # (tb, 1)  == dist^2

    if needs_mask:
        # Ragged last tile / over-covered grid point: neutralize padded rows
        # via selects (NaN-safe) BEFORE sqrt so garbage never propagates.
        tile = c * pl.num_programs(1) + i
        start = tile * block_rows
        row_ids = start + lax.broadcasted_iota(jnp.int32, sq.shape, 0)
        sq = jnp.where(row_ids < total_b, sq, 0.0)
        lane_ids = start + lax.broadcasted_iota(jnp.int32, lbl.shape, 1)
        lbl = jnp.where(lane_ids < total_b, lbl, 0.0)

    dist = jnp.sqrt(sq)                             # needed only for the hinge
    hinge = jnp.maximum(margin - dist, 0.0)
    h2 = hinge * hinge                              # (tb, 1)

    # per-row loss = (1-l)*sq + l*h2 = sq + l*(h2 - sq)
    # row-sum = sum(sq)  (XLU reduce)  +  (1,tb)x(tb,1) dot  (idle MXU).
    weighted = jnp.dot(lbl, h2 - sq,
                       precision=jax.lax.Precision.HIGHEST,
                       preferred_element_type=jnp.float32)   # (1, 1)
    partial = weighted + jnp.sum(sq)                          # (1, 1)
    out_ref[...] = out_ref[...] + partial                     # broadcast into (1, 128)


def contrastive_loss(output1, output2, label, *, margin=MARGIN, block_rows=None):
    """output1, output2: (B, D) float32/bf16; label: (B,) or (B, 1). Returns scalar loss."""
    B, D = output1.shape
    label = jnp.asarray(label, dtype=jnp.float32).reshape(1, B)   # lane-dense labels

    itemsize = jnp.dtype(output1.dtype).itemsize
    budget, vmem_limit = _vmem_plan()
    # Per-row VMEM bytes: 2 streamed inputs x 2 pipeline buffers, plus ~3
    # full-tile f32 temporaries (upcasts / diff / square), plus label + slack.
    per_row = D * (4 * itemsize + 12) + 128
    rows_max = max(128, (budget // per_row) // 128 * 128)

    if block_rows is None:
        if B <= rows_max:
            tb = B
        else:
            n_tiles = _cdiv(B, rows_max)
            n_tiles = _cdiv(n_tiles, _NUM_CORES) * _NUM_CORES    # even core split
            tb = _cdiv(_cdiv(B, n_tiles), 128) * 128             # 128-row aligned
    else:
        tb = int(block_rows)
        if tb >= B:
            tb = B
        elif tb % 128 != 0:
            raise ValueError("block_rows must equal B or be a multiple of 128")

    total_tiles = _cdiv(B, tb)
    num_cores = 1 if total_tiles == 1 else _NUM_CORES
    tiles_per_core = _cdiv(total_tiles, num_cores)
    grid = (num_cores, tiles_per_core)
    needs_mask = (num_cores * tiles_per_core * tb) != B

    def act_map(c, i):
        t = jnp.minimum(c * tiles_per_core + i, total_tiles - 1)   # clamp overflow tile
        return (t, 0)

    def lbl_map(c, i):
        t = jnp.minimum(c * tiles_per_core + i, total_tiles - 1)
        return (0, t)

    kernel = functools.partial(
        _contrastive_loss_kernel,
        total_b=B, block_rows=tb, margin=float(margin), needs_mask=needs_mask)

    cost = pl.CostEstimate(
        flops=int(3 * B * D + 8 * B),
        transcendentals=int(B),
        bytes_accessed=int(2 * B * D * itemsize + B * 4 + num_cores * 128 * 4))

    out = pl.pallas_call(
        kernel,
        out_shape=jax.ShapeDtypeStruct((1, 128 * num_cores), jnp.float32),
        grid=grid,
        in_specs=[
            pl.BlockSpec((tb, D), act_map),
            pl.BlockSpec((tb, D), act_map),
            pl.BlockSpec((1, tb), lbl_map),
        ],
        # Each core owns its own lane-aligned 128-wide slice of the output and
        # keeps it resident across its tile loop (accumulator).
        out_specs=pl.BlockSpec((1, 128), lambda c, i: (0, c)),
        compiler_params=pltpu.CompilerParams(
            dimension_semantics=("parallel", "arbitrary"),
            vmem_limit_bytes=vmem_limit),
        cost_estimate=cost,
    )(output1, output2, label)

    partials = out.reshape(num_cores, 128)[:, 0]      # one partial sum per core
    return (jnp.sum(partials) / B).reshape(())


def _reference(o1, o2, label, margin=MARGIN):
    o1 = o1.astype(jnp.float32)
    o2 = o2.astype(jnp.float32)
    label = jnp.asarray(label, dtype=jnp.float32).reshape(o1.shape[0], 1)
    d = o1 - o2 + _EPS
    dist = jnp.sqrt(jnp.sum(d * d, axis=-1, keepdims=True))
    return jnp.mean((1.0 - label) * dist ** 2
                    + label * jnp.maximum(margin - dist, 0.0) ** 2)


if __name__ == "__main__":
    key = jax.random.PRNGKey(0)
    k1, k2, k3, k4, k5, k6 = jax.random.split(key, 6)

    # Test 1: small demo shape (single tile, single-core grid), f32.
    B, D = 8, 32
    o1 = jax.random.normal(k1, (B, D), dtype=jnp.float32)
    o2 = jax.random.normal(k2, (B, D), dtype=jnp.float32)
    lbl = jax.random.bernoulli(k3, p=0.5, shape=(B, 1)).astype(jnp.float32)
    loss = contrastive_loss(o1, o2, lbl)
    jax.block_until_ready(loss)
    ref = _reference(o1, o2, lbl)
    assert jnp.allclose(loss, ref, rtol=1e-5, atol=1e-5), (loss, ref)

    # Test 2: forced multi-tile, two-core (2,2) grid with a ragged last tile
    # AND an over-covered (fully masked, clamped) grid point: 300 rows, tb=128.
    B2, D2, TB2 = 300, 128, 128
    o1b = jax.random.normal(k4, (B2, D2), dtype=jnp.float32)
    o2b = jax.random.normal(k5, (B2, D2), dtype=jnp.float32)
    lblb = jax.random.bernoulli(k6, p=0.5, shape=(B2, 1)).astype(jnp.float32)
    loss2 = contrastive_loss(o1b, o2b, lblb, block_rows=TB2)
    jax.block_until_ready(loss2)
    ref2 = _reference(o1b, o2b, lblb)
    assert jnp.allclose(loss2, ref2, rtol=1e-5, atol=1e-5), (loss2, ref2)

    # Test 3: bf16 inputs stream as bf16 and are upcast in-kernel.
    loss3 = contrastive_loss(o1.astype(jnp.bfloat16), o2.astype(jnp.bfloat16), lbl)
    jax.block_until_ready(loss3)
    ref3 = _reference(o1.astype(jnp.bfloat16), o2.astype(jnp.bfloat16), lbl)
    assert jnp.allclose(loss3, ref3, rtol=1e-2, atol=1e-2), (loss3, ref3)

    print("KERNEL_OK")
</pallas_src>

<mosaic_0001>
module attributes {stable_mosaic.version = 11 : i64} {
  func.func @_contrastive_loss_kernel(%arg0: i32, %arg1: i32, %arg2: memref<8x32xf32, #tpu.memory_space<vmem>>, %arg3: memref<8x32xf32, #tpu.memory_space<vmem>>, %arg4: memref<1x8xf32, #tpu.memory_space<vmem>>, %arg5: memref<1x128xf32, #tpu.memory_space<vmem>>) attributes {dimension_semantics = [#tpu.dimension_semantics<parallel>, #tpu.dimension_semantics<arbitrary>], iteration_bounds = array<i64: 1, 1>, scalar_prefetch = 0 : i64, scratch_operands = 0 : i64, tpu.core_type = #tpu.core_type<tc>, window_params = [{transform_indices = @transform_0, window_bounds = array<i64: 8, 32>}, {transform_indices = @transform_1, window_bounds = array<i64: 8, 32>}, {transform_indices = @transform_2, window_bounds = array<i64: 1, 8>}, {transform_indices = @transform_3, window_bounds = array<i64: 1, 128>}]} {
    %c0_i32 = arith.constant 0 : i32
    %0 = arith.cmpi eq, %arg1, %c0_i32 : i32
    %1 = arith.extui %0 : i1 to i32
    %c0_i32_0 = arith.constant 0 : i32
    %2 = arith.cmpi ne, %1, %c0_i32_0 : i32
    scf.if %2 {
      %cst_15 = arith.constant 0.000000e+00 : f32
      %30 = vector.broadcast %cst_15 : f32 to vector<1x128xf32>
      %c0_16 = arith.constant 0 : index
      %c0_17 = arith.constant 0 : index
      %31 = vector.load %arg5[%c0_16, %c0_17] : memref<1x128xf32, #tpu.memory_space<vmem>>, vector<1x128xf32>
      tpu.vector_store %arg5[%c0_16, %c0_17], %30 {strides = array<i32>} : memref<1x128xf32, #tpu.memory_space<vmem>>, vector<1x128xf32>,
    } else {
    }
    %c0 = arith.constant 0 : index
    %c0_1 = arith.constant 0 : index
    %3 = vector.load %arg2[%c0, %c0_1] : memref<8x32xf32, #tpu.memory_space<vmem>>, vector<8x32xf32>
    %c0_2 = arith.constant 0 : index
    %c0_3 = arith.constant 0 : index
    %4 = vector.load %arg3[%c0_2, %c0_3] : memref<8x32xf32, #tpu.memory_space<vmem>>, vector<8x32xf32>
    %c0_4 = arith.constant 0 : index
    %c0_5 = arith.constant 0 : index
    %5 = vector.load %arg4[%c0_4, %c0_5] : memref<1x8xf32, #tpu.memory_space<vmem>>, vector<1x8xf32>
    %6 = arith.subf %3, %4 : vector<8x32xf32>
    %cst = arith.constant 9.99999997E-7 : f32
    %7 = vector.broadcast %cst : f32 to vector<8x32xf32>
    %8 = arith.addf %6, %7 : vector<8x32xf32>
    %9 = arith.mulf %8, %8 : vector<8x32xf32>
    %cst_6 = arith.constant dense<0.000000e+00> : vector<8xf32>
    %10 = vector.multi_reduction <add>, %9, %cst_6 [1] : vector<8x32xf32> to vector<8xf32>
    %11 = vector.shape_cast %10 : vector<8xf32> to vector<8x1xf32>
    %12 = math.sqrt %11 : vector<8x1xf32>
    %cst_7 = arith.constant 2.000000e+00 : f32
    %13 = vector.broadcast %cst_7 : f32 to vector<8x1xf32>
    %14 = arith.subf %13, %12 : vector<8x1xf32>
    %cst_8 = arith.constant 0.000000e+00 : f32
    %15 = vector.broadcast %cst_8 : f32 to vector<8x1xf32>
    %16 = arith.maximumf %14, %15 : vector<8x1xf32>
    %17 = arith.mulf %16, %16 : vector<8x1xf32>
    %18 = arith.subf %17, %11 : vector<8x1xf32>
    %cst_9 = arith.constant dense<0.000000e+00> : vector<1x1xf32>
    %19 = tpu.matmul %5, %18, %cst_9 {dimension_numbers = #tpu.dot_dimension_numbers<[1], [0], [0], [1], [0, 0, 1, 1], [], []>, precision = #tpu.contract_precision<fp32>} : vector<1x8xf32>, vector<8x1xf32>, vector<1x1xf32> -> vector<1x1xf32>
    %20 = vector.shape_cast %11 : vector<8x1xf32> to vector<1x8x1xf32>
    %cst_10 = arith.constant dense<0.000000e+00> : vector<1xf32>
    %21 = vector.multi_reduction <add>, %20, %cst_10 [1, 2] : vector<1x8x1xf32> to vector<1xf32>
    %22 = vector.shape_cast %21 : vector<1xf32> to vector<1x1x1xf32>
    %23 = vector.extract %22[0, 0, 0] : f32 from vector<1x1x1xf32>
    %24 = vector.broadcast %23 : f32 to vector<1x1xf32>
    %25 = arith.addf %19, %24 : vector<1x1xf32>
    %c0_11 = arith.constant 0 : index
    %c0_12 = arith.constant 0 : index
    %26 = vector.load %arg5[%c0_11, %c0_12] : memref<1x128xf32, #tpu.memory_space<vmem>>, vector<1x128xf32>
    %27 = vector.broadcast %25 : vector<1x1xf32> to vector<1x128xf32>
    %28 = arith.addf %26, %27 : vector<1x128xf32>
    %c0_13 = arith.constant 0 : index
    %c0_14 = arith.constant 0 : index
    %29 = vector.load %arg5[%c0_13, %c0_14] : memref<1x128xf32, #tpu.memory_space<vmem>>, vector<1x128xf32>
    tpu.vector_store %arg5[%c0_13, %c0_14], %28 {strides = array<i32>} : memref<1x128xf32, #tpu.memory_space<vmem>>, vector<1x128xf32>,
    return
  }
  func.func @transform_0(%arg0: i32, %arg1: i32) -> (i32, i32) {
    %c1_i32 = arith.constant 1 : i32
    %0 = arith.muli %arg0, %c1_i32 : i32
    %1 = arith.addi %0, %arg1 : i32
    %c0_i32 = arith.constant 0 : i32
    %2 = arith.minsi %1, %c0_i32 : i32
    %c0_i32_0 = arith.constant 0 : i32
    %c0_i32_1 = arith.constant 0 : i32
    return %2, %c0_i32_0 : i32, i32
  }
  func.func @transform_1(%arg0: i32, %arg1: i32) -> (i32, i32) {
    %c1_i32 = arith.constant 1 : i32
    %0 = arith.muli %arg0, %c1_i32 : i32
    %1 = arith.addi %0, %arg1 : i32
    %c0_i32 = arith.constant 0 : i32
    %2 = arith.minsi %1, %c0_i32 : i32
    %c0_i32_0 = arith.constant 0 : i32
    %c0_i32_1 = arith.constant 0 : i32
    return %2, %c0_i32_0 : i32, i32
  }
  func.func @transform_2(%arg0: i32, %arg1: i32) -> (i32, i32) {
    %c1_i32 = arith.constant 1 : i32
    %0 = arith.muli %arg0, %c1_i32 : i32
    %1 = arith.addi %0, %arg1 : i32
    %c0_i32 = arith.constant 0 : i32
    %2 = arith.minsi %1, %c0_i32 : i32
    %c0_i32_0 = arith.constant 0 : i32
    %c0_i32_1 = arith.constant 0 : i32
    return %c0_i32_0, %2 : i32, i32
  }
  func.func @transform_3(%arg0: i32, %arg1: i32) -> (i32, i32) {
    %c0_i32 = arith.constant 0 : i32
    %c0_i32_0 = arith.constant 0 : i32
    return %c0_i32, %arg0 : i32, i32
  }
}

</mosaic_0001>

<bundles_post_ra>
// kernel: tpu_custom_call.1
= control target key start
LH: loop header
LB: loop body
LE: loop exit
PB: predicated region body
PF: predicated region fallthrough
CT: control target
= control target key end

     0   :  { %8 = vsyncpa [#allocation3], 0  ;;  %s805_s0 = inlined_call_operand.hbm [shape: f32[8,32], index: 0, kind: input, shape index: {}]   ;;  %s806_s1 = inlined_call_operand.hbm [shape: f32[8,32], index: 1, kind: input, shape index: {}]   ;;  %s807_s2 = inlined_call_operand.vmem [shape: f32[1,8], index: 2, kind: input, shape index: {}]   ;;  %s808_s3 = inlined_call_operand.hbm [shape: f32[1,128], index: 3, kind: output, shape index: {}]  }
   0x1   :  { %9 = vsyncpa [#allocation6], 0 }
   0x2   :  { %10 = vsyncpa [#allocation4], 0  ;;  %s734_s12 = smov [#allocation2]   ;;  %s735_s14 = smov [#allocation5]  }
   0x3   :  { %s22_s13 = sshll.u32 %s734_s12, 4  ;;  %s37_s15 = sshll.u32 %s735_s14, 4  ;;  %s23_s13 = int_to_ptr.vmem [resolvable:$true] %s22_s13  ;;  %s38_s15 = int_to_ptr.vmem [resolvable:$true] %s37_s15 }
   0x4   :  { %s662_s18 = scalar_lea.hbm %s805_s0, 128 }
   0x5   :  { %p663_p0 = scmp.ne.s32.totalorder %s805_s0, %s662_s18  ;;  %p666_p1 = scmp.lt.u32.totalorder %s662_s18, %s805_s0 }
   0x7   :  { %p668_p2 = pnand %p666_p1, %p663_p0 }
   0x9   :  { %671 = shalt.err (!%p668_p2)
}
   0xa   :  { %s672_s23 = scalar_lea.vmem %s23_s13, 128  ;;  %p677_p4 = scmp.lt.s32.totalorder %s23_s13, %s23_s13 }
   0xb   :  { %p673_p3 = scmp.ne.s32.totalorder %s23_s13, %s672_s23  ;;  %p678_p5 = scmp.lt.s32.totalorder %s672_s23, %s672_s23 }
   0xd   :  { %p679_p6 = por %p678_p5, %p677_p4 }
   0xf   :  { %p680_p7 = pnand %p679_p6, %p673_p3 }
  0x11   :  { %683 = shalt.err (!%p680_p7)
}
  0x12   :  { %25 = dma.hbm_to_vmem [thread:$0]  %s805_s0, 128, %s23_s13, [#allocation3]  }
  0x13   :  { %s684_s28 = scalar_lea.hbm %s806_s1, 128 }
  0x14   :  { %p685_p8 = scmp.ne.s32.totalorder %s806_s1, %s684_s28  ;;  %p688_p9 = scmp.lt.u32.totalorder %s684_s28, %s806_s1 }
  0x16   :  { %p690_p10 = pnand %p688_p9, %p685_p8 }
  0x18   :  { %693 = shalt.err (!%p690_p10)
}
  0x19   :  { %s694_s6 = scalar_lea.vmem %s38_s15, 128  ;;  %p699_p12 = scmp.lt.s32.totalorder %s38_s15, %s38_s15 }
  0x1a   :  { %p695_p11 = scmp.ne.s32.totalorder %s38_s15, %s694_s6  ;;  %p700_p13 = scmp.lt.s32.totalorder %s694_s6, %s694_s6 }
  0x1c   :  { %p701_p0 = por %p700_p13, %p699_p12 }
  0x1e   :  { %p702_p1 = pnand %p701_p0, %p695_p11 }
  0x20   :  { %705 = shalt.err (!%p702_p1)
}
  0x21   :  { %40 = dma.hbm_to_vmem [thread:$0]  %s806_s1, 128, %s38_s15, [#allocation6]  }
  0x22   :  { %728 = dma.done.wait [#allocation3], 128  }
  0x23   :  { %729 = vsyncadd [#allocation3], 4294967168 }
  0x24   :  { %730 = dma.done.wait [#allocation6], 128  }
  0x25   :  { %731 = vsyncadd [#allocation6], 4294967168  ;;  %v736_v0 = vmov 0.0   ;;  %v84_v1 = vld [vmem:[#allocation2] sm:$0xff]  ;;  %v85_v2 = vld [vmem:[#allocation5] sm:$0xff]  ;;  %vm90_vm0 = vcmask 261120  }
  0x26   :  { %83 = vst [vmem:[#allocation7] sm:$0x1] %v736_v0  ;;  %610 = vmatprep.subr.mxu1 %v736_v0  ;;  %625 = vmatprep.subr.mxu0 %v736_v0  ;;  %v87_v3 = vsub.f32 %v84_v1, %v85_v2  ;;  %vm737_vm1 = vmmov 0   ;;  %vm105_vm2 = vcmask 7168   ;;  %v86_v9 = vld [vmem:[%s807_s2] sm:$0x1] }
  0x27   :  { %612 = vmatprep.mubr.msk.f32.mxu1 %vm737_vm1, %v736_v0  ;;  %627 = vmatprep.mubr.msk.f32.mxu0 %vm737_vm1, %v736_v0  ;;  %vm117_vm3 = vcmask 64512   ;;  %v738_v30 = vmov 0   ;;  %s739_s9 = smov [#allocation7]  }
  0x28   :  { %v88_v4 = vadd.f32 1e-06, %v87_v3  ;;  %v119_v10 = vsel %vm117_vm3, %v86_v9, 0  ;;  %658 = vset.pattern.permute.xlu1 %v738_v30  ;;  %659 = vset.pattern.permute.xlu0 %v738_v30  ;;  %s581_s10 = sshll.u32 %s739_s9, 4  ;;  %s582_s10 = int_to_ptr.vmem [resolvable:$true] %s581_s10 }
  0x29   :  { %v187_v11 = vand.u32 4294901760, %v119_v10  ;;  %s706_s11 = scalar_lea.vmem %s582_s10, 16  ;;  %s710_s12 = scalar_lea.vmem %s582_s10, 32 }
  0x2a   :  { %v89_v5 = vmul.f32 %v88_v4, %v88_v4  ;;  %p707_p2 = scmp.ne.s32.totalorder %s582_s10, %s706_s11  ;;  %p711_p3 = scmp.lt.s32.totalorder %s582_s10, %s582_s10 }
  0x2b   :  { %v188_v13 = vsub.f32 %v119_v10, %v187_v11  ;;  %p712_p4 = scmp.lt.s32.totalorder %s710_s12, %s706_s11 }
  0x2c   :  { %v91_v6 = vsel %vm90_vm0, %v89_v5, 0.0 }
  0x2d   :  { %92 = vadd.xlane.f32.xlu0 %v91_v6  ;;  %v189_v18 = vand.u32 4294901760, %v188_v13  ;;  %v567_v45 = vld [vmem:[#allocation7] sm:$0x1]  ;;  %p713_p5 = por %p712_p4, %p711_p3 }
  0x2f   :  { %v190_v21 = vsub.f32 %v188_v13, %v189_v18  ;;  %p714_p6 = pnand %p713_p5, %p707_p2 }
  0x31   :  { %v191_v24 = vand.u32 4294901760, %v190_v21 }
  0xba   :  { %v93_v7 = vpop.xlane.xlu0 %92 }
  0xbb   :  { %660 = vrsqrt.f32 %v93_v7  ;;  %v106_v8 = vsel %vm105_vm2, %v93_v7, 0.0  ;;  %vm96_vm4 = vcmp.eq.f32.partialorder %v93_v7, inf  ;;  %v99_v15 = vand.u32 2147483648, %v93_v7 }
  0xbc   :  { %107 = vadd.xlane.f32.xlu0 %v106_v8  ;;  %vm98_vm5 = vcmp.eq.f32.partialorder %v93_v7, 0.0 }
  0xc5   :  { %v661_v12 = vpop.eup %660 }
  0xc6   :  { %v95_v14 = vmul.f32 %v661_v12, %v93_v7 }
  0xc8   :  { %v97_v16 = vsel %vm96_vm4, %v93_v7, %v95_v14 }
  0xc9   :  { %v100_v17 = vsel %vm98_vm5, %v99_v15, %v97_v16 }
  0xca   :  { %v101_v19 = vsub.f32 2.0, %v100_v17 }
  0xcc   :  { %v102_v20 = vmax.f32 %v101_v19, 0.0 }
  0xce   :  { %v103_v22 = vmul.f32 %v102_v20, %v102_v20 }
  0xd0   :  { %v104_v23 = vsub.f32 %v103_v22, %v93_v7 }
  0xd2   :  { %v122_v25 = vand.u32 4294901760, %v104_v23 }
  0xd4   :  { %611 = vmatpush3.msra.mxu1 %v122_v25  ;;  %v199_v26 = vsub.f32 %v104_v23, %v122_v25  ;;  %626 = vmatpush3.msra.mxu0 %v122_v25 }
  0xd5   :  { %613 = vmatmul.mubr.f32.vlgmr.msra.gmra.mrb[0].mxu1 %v191_v24  ;;  %628 = vmatmul.mubr.f32.vlgmr.msra.gmra.mrb[0].mxu0 %v189_v18 }
  0xd6   :  { %630 = vmatprep.subr.mxu0 %v736_v0  ;;  %v200_v27 = vand.u32 4294901760, %v199_v26  ;;  %615 = vmatprep.subr.mxu1 %v736_v0 }
  0xd7   :  { %617 = vmatprep.mubr.msk.f32.mxu1 %vm737_vm1, %v736_v0  ;;  %632 = vmatprep.mubr.msk.f32.mxu0 %vm737_vm1, %v736_v0 }
  0xd8   :  { %631 = vmatpush3.msra.mxu0 %v200_v27  ;;  %v201_v28 = vsub.f32 %v199_v26, %v200_v27 }
  0xd9   :  { %635 = vmatprep.subr.mxu0 %v736_v0 }
  0xda   :  { %v202_v29 = vand.u32 4294901760, %v201_v28 }
  0xdc   :  { %616 = vmatpush3.msra.mxu1 %v202_v29 }
  0xdd   :  { %618 = vmatmul.mubr.f32.vlgmr.msra.gmra.mrb[0].mxu1 %v187_v11  ;;  %620 = vmatprep.subr.mxu1 %v736_v0 }
  0xde   :  { %633 = vmatmul.mubr.f32.vlgmr.msra.gmra.mrb[0].mxu0 %v187_v11  ;;  %621 = vmatpush3.msra.mxu1 %v199_v26 }
  0xdf   :  { %636 = vmatpush3.msra.mxu0 %v122_v25  ;;  %622 = vmatprep.mubr.msk.f32.mxu1 %vm737_vm1, %v736_v0 }
  0xe0   :  { %637 = vmatprep.mubr.msk.f32.mxu0 %vm737_vm1, %v736_v0 }
  0xe5   :  { %623 = vmatmul.mubr.f32.vlgmr.msra.gmra.mrb[0].mxu1 %v188_v13 }
  0xe6   :  { %638 = vmatmul.mubr.f32.vlgmr.msra.gmra.mrb[0].mxu0 %v187_v11 }
 0x149   :  { %v108_v31 = vpop.xlane.xlu0 %107 }
 0x14a   :  { %v109_v32 = vrot.slane %v108_v31, 4 }
 0x14c   :  { %v110_v33 = vadd.f32 %v109_v32, %v108_v31 }
 0x14e   :  { %v111_v34 = vrot.slane %v110_v33, 2 }
 0x150   :  { %v112_v35 = vadd.f32 %v111_v34, %v110_v33 }
 0x152   :  { %v113_v36 = vrot.slane %v112_v35, 1 }
 0x154   :  { %v114_v37 = vadd.f32 %v113_v36, %v112_v35 }
 0x156   :  { %650 = vpush %v114_v37 }
 0x187   :  { %s651_s2 = spop %650 }
 0x188   :  { %v116_v38 = vstv %s651_s2 }
 0x1b8   :  { %v343_v39 = vpop.f32.mrb[0].mxu1 }
 0x1b9   :  { %v640_v40 = vadd.f32 %v343_v39, %v116_v38  ;;  %v563_v41 = vpop.f32.mrb[0].mxu0  ;;  %v624_v42 = vpop.f32.mrb[1].mxu1 }
 0x1ba   :  { %v639_v43 = vpop.f32.mrb[1].mxu0 }
 0x1bb   :  { %v641_v44 = vadd.f32 %v640_v40, %v563_v41 }
 0x1bd   :  { %570 = vperm.xlu1 %658, %v641_v44  }
 0x23c   :  { %v571_v46 = vpop.permute.xlu1 %570 }
 0x23d   :  { %v573_v47 = vadd.f32 %v571_v46, %v567_v45 }
 0x23f   :  { %574 = vst [vmem:[#allocation7] sm:$0x1] %v573_v47 }
 0x240   :  { %717 = shalt.err (!%p714_p6)
}
 0x241   :  { %s718_s15 = scalar_lea.hbm %s808_s3, 16 }
 0x242   :  { %p719_p7 = scmp.ne.s32.totalorder %s808_s3, %s718_s15  ;;  %p722_p8 = scmp.lt.u32.totalorder %s718_s15, %s808_s3 }
 0x244   :  { %p724_p9 = pnand %p722_p8, %p719_p7 }
 0x246   :  { %727 = shalt.err (!%p724_p9)
}
 0x247   :  { %584 = dma.vmem_to_hbm [thread:$0]  %s582_s10, 16, %s808_s3, [#allocation4]  }
 0x248   :  { %732 = dma.done.wait [#allocation4], 16  }
 0x249   :  { %733 = vsyncadd [#allocation4], 4294967280 }
 0x24a   :  { %588 = vsyncpa [#allocation3], 1 }
 0x24b   :  { %589 = vsyncpa [#allocation6], 1 }
 0x24c   :  { %590 = vsyncpa [#allocation4], 1 }

</bundles_post_ra>
